<compile_context>
chip_gen: v7x
topology: tpu7x:2x2x1
jax: 0.10.0
libtpu: 0.0.40
codegen_flags: <defaults>
</compile_context>

<pallas_src>
import jax
import jax.numpy as jnp
from jax.experimental import pallas as pl
from jax.experimental.pallas import tpu as pltpu

NEG_FILL = -1e16


def _round_up(x, m):
    return (x + m - 1) // m * m


def gat_attention_kernel(s_src_ref, s_dst_ref, o_ref):
    # s_src_ref: (1, TI, 1)   source scores for this row tile
    # s_dst_ref: (1, 1, TJ)   destination scores for this column tile
    # o_ref:     (1, TI, TJ)  attention-logit tile
    e = s_src_ref[...] + s_dst_ref[...]                      # broadcast add (1, TI, TJ)
    lr = jnp.maximum(e, jnp.float32(0.1) * e)                # LeakyReLU(0.1), 2 VALU ops
    # LeakyReLU(e) == 0  <=>  e == 0, so key the masked_fill off `e` directly:
    # the compare is off the dependency chain of the select input.
    o_ref[...] = jnp.where(e == 0.0, jnp.float32(NEG_FILL), lr).astype(o_ref.dtype)


def _node_scores(x, atten_W):
    """s[..., 0] = <z_i, atten_W[:D]>, s[..., 1] = <z_j, atten_W[D:]>."""
    D = x.shape[-1]
    A = jnp.stack([atten_W[:D, 0], atten_W[D:, 0]], axis=1).astype(jnp.float32)  # (D, 2)
    return jnp.einsum("bnd,dt->bnt", x, A, preferred_element_type=jnp.float32)   # (B, N, 2)


def gat_layer_forward(x, atten_W, *, ti=512, tj=2048, min_pallas_n=128):
    """Pallas implementation of GATLayer.forward.

    x: [B, N, D] node features, atten_W: [2D, 1].  Returns [B, N, N] f32 logits.
    Per-generation tuning hints: v5e keep the output tile <= ~4 MiB (scoped VMEM
    default 16 MiB); v6e ti=512/tj=2048 is near roofline; v7x ti=1024/tj=2048 if
    the grid still has >= ~4 parallel steps for megacore.
    """
    B, N, D = x.shape
    assert atten_W.shape == (2 * D, 1)

    # Tiny per-node score matmul (glue, f32 accumulate; x stays in native dtype).
    # NOTE: this reassociates the 2D-length dot product into two D-length sums;
    # bitwise-exact zeros could in principle differ from the single-matmul
    # reference, but the `== 0` masked_fill is inherited fragility of the
    # original module (it was presumably meant to be adjacency masking).
    s = _node_scores(x, atten_W)                                         # (B, N, 2)

    if N <= min_pallas_n:
        # Small-N fallback: lane padding + per-step overhead make the Pallas
        # path uncompetitive; XLA fuses this into one elementwise kernel.
        e = s[:, :, None, 0] + s[:, None, :, 1]                          # (B, N, N)
        lr = jnp.maximum(e, 0.1 * e)
        return jnp.where(e == 0.0, jnp.float32(NEG_FILL), lr)

    # Tile sizes: lane-dense output (TJ multiple of 128), sublane-aligned TI.
    ti_eff = min(ti, _round_up(N, 8))
    tj_eff = min(tj, _round_up(N, 128))
    ni_pad = _round_up(N, ti_eff)
    nj_pad = _round_up(N, tj_eff)

    s_src = jnp.pad(s[..., 0], ((0, 0), (0, ni_pad - N)))[:, :, None]    # (B, Ni, 1)
    s_dst = jnp.pad(s[..., 1], ((0, 0), (0, nj_pad - N)))[:, None, :]    # (B, 1, Nj)

    grid = (B, ni_pad // ti_eff, nj_pad // tj_eff)                       # j innermost
    out_bytes = B * ni_pad * nj_pad * 4
    in_bytes = (B * ni_pad + B * nj_pad) * 4
    cost = pl.CostEstimate(
        flops=4 * B * ni_pad * nj_pad,          # add, mul, max, select per element
        transcendentals=0,
        bytes_accessed=out_bytes + in_bytes,
    )

    out = pl.pallas_call(
        gat_attention_kernel,
        out_shape=jax.ShapeDtypeStruct((B, ni_pad, nj_pad), jnp.float32),
        grid=grid,
        in_specs=[
            pl.BlockSpec((1, ti_eff, 1), lambda b, i, j: (b, i, 0)),
            pl.BlockSpec((1, 1, tj_eff), lambda b, i, j: (b, 0, j)),
        ],
        out_specs=pl.BlockSpec((1, ti_eff, tj_eff), lambda b, i, j: (b, i, j)),
        compiler_params=pltpu.CompilerParams(
            dimension_semantics=("parallel", "parallel", "parallel"),
            vmem_limit_bytes=32 * 1024 * 1024,
        ),
        cost_estimate=cost,
    )(s_src, s_dst)

    return out[:, :N, :N]


def gat_layer_reference(x, atten_W):
    """Pure-JAX mirror of the PyTorch forward for verification."""
    B, N, D = x.shape
    b = jnp.broadcast_to(x[:, :, None, :], (B, N, N, D))   # z repeated along dim 2
    c = jnp.broadcast_to(x[:, None, :, :], (B, N, N, D))   # z repeated along dim 1
    e = jnp.concatenate([b, c], axis=3).reshape(B, N * N, 2 * D)
    att = jnp.matmul(e, atten_W).reshape(B, N, N)
    att = jnp.where(att > 0, att, 0.1 * att)                # LeakyReLU(0.1)
    att = jnp.where(att == 0, NEG_FILL, att)                # masked_fill(==0, -1e16)
    return att


def xavier_normal(key, shape, gain):
    fan_in, fan_out = shape[0], shape[1]
    std = gain * jnp.sqrt(2.0 / (fan_in + fan_out))
    return std * jax.random.normal(key, shape, dtype=jnp.float32)


if __name__ == "__main__":
    input_dim = 32        # feat (W is unused in forward)
    output_dim = 32       # D

    key = jax.random.PRNGKey(0)
    k_w, k_aw, k_x1, k_x2 = jax.random.split(key, 4)

    # Deterministic parameter init (xavier_normal_, gain=1.414), as in __init__.
    W = xavier_normal(k_w, (input_dim, output_dim), gain=1.414)          # unused in fwd
    atten_W = xavier_normal(k_aw, (2 * output_dim, 1), gain=1.414)
    # TODO(synk): self.adj (sparse adjacency) only builds a mask the original
    # forward never applies; it does not affect the output, so it is omitted.

    # Case 1: exercises the Pallas kernel path (N > 128 so the grid is real).
    B1, N1 = 2, 256
    x1 = jax.random.normal(k_x1, (B1, N1, output_dim), dtype=jnp.float32)
    out1 = jax.block_until_ready(gat_layer_forward(x1, atten_W))
    ref1 = gat_layer_reference(x1, atten_W)
    assert out1.shape == (B1, N1, N1) and out1.dtype == jnp.float32
    assert jnp.allclose(out1, ref1, rtol=1e-4, atol=1e-4), "Pallas path mismatch"

    # Case 2: the tiny-N shape implied by the module -> fused pure-JAX fallback.
    B2, N2 = 2, 16
    x2 = jax.random.normal(k_x2, (B2, N2, output_dim), dtype=jnp.float32)
    out2 = jax.block_until_ready(gat_layer_forward(x2, atten_W))
    ref2 = gat_layer_reference(x2, atten_W)
    assert out2.shape == (B2, N2, N2)
    assert jnp.allclose(out2, ref2, rtol=1e-4, atol=1e-4), "fallback path mismatch"

    print("KERNEL_OK")
</pallas_src>

<mosaic_0001>
module attributes {stable_mosaic.version = 11 : i64} {
  func.func @gat_attention_kernel(%arg0: i32, %arg1: i32, %arg2: i32, %arg3: memref<1x256x1xf32, #tpu.memory_space<vmem>>, %arg4: memref<1x1x256xf32, #tpu.memory_space<vmem>>, %arg5: memref<1x256x256xf32, #tpu.memory_space<vmem>>) attributes {dimension_semantics = [#tpu.dimension_semantics<parallel>, #tpu.dimension_semantics<parallel>, #tpu.dimension_semantics<parallel>], iteration_bounds = array<i64: 2, 1, 1>, scalar_prefetch = 0 : i64, scratch_operands = 0 : i64, tpu.core_type = #tpu.core_type<tc>, window_params = [{transform_indices = @transform_0, window_bounds = array<i64: 1, 256, 1>}, {transform_indices = @transform_1, window_bounds = array<i64: 1, 1, 256>}, {transform_indices = @transform_2, window_bounds = array<i64: 1, 256, 256>}]} {
    %c0 = arith.constant 0 : index
    %c0_0 = arith.constant 0 : index
    %c0_1 = arith.constant 0 : index
    %0 = vector.load %arg3[%c0, %c0_0, %c0_1] : memref<1x256x1xf32, #tpu.memory_space<vmem>>, vector<1x256x1xf32>
    %c0_2 = arith.constant 0 : index
    %c0_3 = arith.constant 0 : index
    %c0_4 = arith.constant 0 : index
    %1 = vector.load %arg4[%c0_2, %c0_3, %c0_4] : memref<1x1x256xf32, #tpu.memory_space<vmem>>, vector<1x1x256xf32>
    %2 = vector.broadcast %0 : vector<1x256x1xf32> to vector<1x256x256xf32>
    %3 = vector.broadcast %1 : vector<1x1x256xf32> to vector<1x256x256xf32>
    %4 = arith.addf %2, %3 : vector<1x256x256xf32>
    %cst = arith.constant 1.000000e-01 : f32
    %5 = vector.broadcast %cst : f32 to vector<1x256x256xf32>
    %6 = arith.mulf %5, %4 : vector<1x256x256xf32>
    %7 = arith.maximumf %4, %6 : vector<1x256x256xf32>
    %cst_5 = arith.constant 0.000000e+00 : f32
    %8 = vector.broadcast %cst_5 : f32 to vector<1x256x256xf32>
    %9 = arith.cmpf oeq, %4, %8 : vector<1x256x256xf32>
    %cst_6 = arith.constant -1.000000e+16 : f32
    %10 = vector.broadcast %cst_6 : f32 to vector<1x256x256xf32>
    %11 = arith.select %9, %10, %7 : vector<1x256x256xi1>, vector<1x256x256xf32>
    %c0_7 = arith.constant 0 : index
    %c0_8 = arith.constant 0 : index
    %c0_9 = arith.constant 0 : index
    %12 = vector.load %arg5[%c0_7, %c0_8, %c0_9] : memref<1x256x256xf32, #tpu.memory_space<vmem>>, vector<1x256x256xf32>
    tpu.vector_store %arg5[%c0_7, %c0_8, %c0_9], %11 {strides = array<i32>} : memref<1x256x256xf32, #tpu.memory_space<vmem>>, vector<1x256x256xf32>,
    return
  }
  func.func @transform_0(%arg0: i32, %arg1: i32, %arg2: i32) -> (i32, i32, i32) {
    %c0_i32 = arith.constant 0 : i32
    %c0_i32_0 = arith.constant 0 : i32
    return %arg0, %arg1, %c0_i32 : i32, i32, i32
  }
  func.func @transform_1(%arg0: i32, %arg1: i32, %arg2: i32) -> (i32, i32, i32) {
    %c0_i32 = arith.constant 0 : i32
    %c0_i32_0 = arith.constant 0 : i32
    return %arg0, %c0_i32, %arg2 : i32, i32, i32
  }
  func.func @transform_2(%arg0: i32, %arg1: i32, %arg2: i32) -> (i32, i32, i32) {
    %c0_i32 = arith.constant 0 : i32
    return %arg0, %arg1, %arg2 : i32, i32, i32
  }
}

</mosaic_0001>

<bundles_post_ra>
// kernel: tpu_custom_call.1
= control target key start
LH: loop header
LB: loop body
LE: loop exit
PB: predicated region body
PF: predicated region fallthrough
CT: control target
= control target key end

     0   :  { %7 = vsyncpa [#allocation3], 0  ;;  %s1411_s0 = inlined_call_operand.vmem [shape: f32[2,256,1], index: 0, kind: input, shape index: {}]   ;;  %s1412_s1 = inlined_call_operand.vmem [shape: f32[2,1,256], index: 1, kind: input, shape index: {}]   ;;  %s1413_s2 = inlined_call_operand.hbm [shape: f32[2,256,256], index: 2, kind: output, shape index: {}]  }
   0x1   :  { %9 = vsyncpa [#allocation3 + $0x1], 0  ;;  %s1097_s9 = smov 0   ;;  %s1099_s10 = smov 0  }
   0x2   :  { %s1101_s11 = smov 0   ;;  %s1103_s12 = smov 0  }
   0x3   :  { %s1105_s13 = smov 0   ;;  %s1107_s14 = smov 0  }
   0x4 LB: > { %s922_s15 = sadd.s32 4294967295, %s1076_s14   ;;  %s923_s16 = sadd.s32 4294967294, %s1076_s14   ;;  %s1076_s14 = sphi %s1107_s14, %s15_s14   ;;  %s1072_s13 = sphi %s1105_s13, %s1420_s13   ;;  %s1068_s12 = sphi %s1103_s12, %s1419_s12   ;;  %s1064_s11 = sphi %s1101_s11, %s1418_s11   ;;  %s1060_s10 = sphi %s1099_s10, %s1417_s10   ;;  %s1056_s9 = sphi %s1097_s9, %s1416_s9  }
   0x5   : > { %s34_s17 = sadd.s32 1, %s1072_s13  ;;  %s101_s18 = sadd.s32 1, %s1064_s11 }
   0x6   : > { %p36_p0 = scmp.ge.s32.totalorder %s34_s17, 2  ;;  %p111_p1 = scmp.ne.s32.totalorder %s1064_s11, %s1060_s10 }
   0x7   : > { %p112_p2 = scmp.eq.s32.totalorder %s922_s15, 1  ;;  %p117_p3 = scmp.ne.s32.totalorder %s1060_s10, %s1056_s9 }
   0x8   : > { %s1422_s17 = smov (%p36_p0, %s34_s17), 0  ;;  %p118_p5 = scmp.eq.s32.totalorder %s923_s16, 1 }
   0x9   : > { %p1137_p4 = por %p112_p2, %p111_p1  ;;  %s94_s20 = ssub.s32 %s1072_s13, %s1422_s17 }
   0xa   : > { %p926_p6 = scmp.ge.s32.totalorder %s1076_s14, 1  ;;  %p99_p7 = scmp.eq.s32.totalorder %s94_s20, 0 }
   0xb   : > { %p1144_p8 = por %p118_p5, %p117_p3  ;;  %p161_p9 = scmp.lt.s32.totalorder %s1076_s14, 3 }
   0xc   : > { %s1150_s22 = scalar_select %p99_p7, %s1064_s11, %s101_s18  }
   0xd   : > { %p162_p10 = pnand %p926_p6, %p161_p9 }
   0xe   : > { %p196_p11 = scmp.lt.s32.totalorder (!%p162_p10), %s1068_s12, 1  ;;  %v1078_v0 = vmov (!%p162_p10), 0   ;;  %v410_v33 = vlaneseq (!%p162_p10)  ;;  %s192_s4 = sand.u32 (!%p162_p10), 1, %s1060_s10  }
   0xf   : > { %165 = sbr.rel (%p162_p10) target bundleno = 254 (0xfe), region = 28  ;;  %997 = vset.pattern.permute.xlu1 (!%p162_p10), %v1078_v0  ;;  %996 = vset.pattern.permute.xlu0 (!%p162_p10), %v1078_v0  ;;  %s927_s5 = sshll.u32 (!%p162_p10), %s192_s4, 9 }
  0x10   : > { %v411_v34 = vshrl.u32 (!%p162_p10), %v410_v33, 7  ;;  %s1215_s6 = scalar_lea.vmem (!%p162_p10), [#allocation2], %s927_s5  ;;  %s937_s7 = sshll.u32 (!%p162_p10), %s1068_s12, 13 }
  0x11   : > { %s823_s8 = sshll.u32 (!%p162_p10), %s1215_s6, 4  ;;  %s1365_s18 = scalar_lea.sflag (!%p162_p10), [#allocation3], %s192_s4  ;;  %s1357_s8 = int_to_ptr.vmem [resolvable:$true] %s823_s8 }
  0x12   : > { %v412_v35 = vsub.s32 (!%p162_p10), 0, %v411_v34  ;;  %v416_v36 = vsub.s32 (!%p162_p10), 1, %v411_v34  ;;  %s998_s20 = scalar_lea.vmem (!%p162_p10), %s1357_s8, 8192 }
  0x13   : > { %p999_p12 = scmp.ne.s32.totalorder (!%p162_p10), %s1357_s8, %s998_s20 }
  0x15   : > { %p1000_p13 = pnand (!%p162_p10), %p999_p12, %p1137_p4 }
  0x16   : > { %s1154_s23 = scalar_select %p196_p11, %s1068_s12, 1 }
  0x17   : > { %s1355_s12 = scalar_lea.hbm %s1413_s2, %s937_s7  ;;  %p1001_p0 = pneg %p1000_p13 }
  0x18   : > { %s936_s24 = sshll.u32 %s1154_s23, 8  ;;  %s930_s28 = sshll.u32 %s1154_s23, 1 }
  0x19   : > { %s1160_s27 = scalar_lea.vmem %s1411_s0, %s936_s24  ;;  %s212_s3 = scalar_lea.vmem %s1412_s1, %s930_s28 }
  0x1a   : > { %v218_v1 = vld [vmem:[%s1160_s27 + $0x10] sm:$0xff]  ;;  %v216_v2 = vld [vmem:[%s1160_s27] sm:$0xff]  ;;  %v219_v3 = vld [vmem:[%s1160_s27 + $0x18] sm:$0xff]  ;;  %s1079_s23 = smov [#allocation2]  }
  0x1b   : > { %261 = vperm.xlu1 %997, %v218_v1   ;;  %251 = vperm.xlu0 %996, %v216_v2   ;;  %v217_v4 = vld [vmem:[%s1160_s27 + $0x8] sm:$0xff]  ;;  %v220_v6 = vld [vmem:[%s1160_s27 + $0x20] sm:$0xff]  ;;  %v223_v7 = vld [vmem:[%s1160_s27 + $0x38] sm:$0xff]  ;;  %s1002_s24 = sshll.u32 %s1079_s23, 4  ;;  %s1003_s24 = int_to_ptr.vmem [resolvable:$false] %s1002_s24 }
  0x1c   : > { %v221_v5 = vld [vmem:[%s1160_s27 + $0x28] sm:$0xff]  ;;  %v222_v8 = vld [vmem:[%s1160_s27 + $0x30] sm:$0xff]  ;;  %v224_v10 = vld [vmem:[%s1160_s27 + $0x40] sm:$0xff]  ;;  %s1004_s25 = scalar_lea.vmem %s1003_s24, 16384  ;;  %p1005_p1 = scmp.lt.s32.totalorder %s1357_s8, %s1003_s24 }
  0x1d   : > { %v225_v9 = vld [vmem:[%s1160_s27 + $0x48] sm:$0xff]  ;;  %v227_v11 = vld [vmem:[%s1160_s27 + $0x58] sm:$0xff]  ;;  %v226_v12 = vld [vmem:[%s1160_s27 + $0x50] sm:$0xff]  ;;  %p1006_p2 = scmp.lt.s32.totalorder %s1004_s25, %s998_s20 }
  0x1e   : > { %v229_v13 = vld [vmem:[%s1160_s27 + $0x68] sm:$0xff]  ;;  %v228_v14 = vld [vmem:[%s1160_s27 + $0x60] sm:$0xff]  ;;  %v231_v15 = vld [vmem:[%s1160_s27 + $0x78] sm:$0xff] }
  0x1f   : > { %266 = vperm.xlu1 %997, %v219_v3   ;;  %256 = vperm.xlu0 %996, %v217_v4   ;;  %v230_v16 = vld [vmem:[%s1160_s27 + $0x70] sm:$0xff]  ;;  %v233_v17 = vld [vmem:[%s1160_s27 + $0x88] sm:$0xff]  ;;  %v232_v18 = vld [vmem:[%s1160_s27 + $0x80] sm:$0xff]  ;;  %p1007_p3 = por %p1006_p2, %p1005_p1 }
  0x20   : > { %v235_v19 = vld [vmem:[%s1160_s27 + $0x98] sm:$0xff]  ;;  %v234_v20 = vld [vmem:[%s1160_s27 + $0x90] sm:$0xff]  ;;  %v237_v21 = vld [vmem:[%s1160_s27 + $0xa8] sm:$0xff] }
  0x21   : > { %v236_v22 = vld [vmem:[%s1160_s27 + $0xa0] sm:$0xff]  ;;  %v239_v23 = vld [vmem:[%s1160_s27 + $0xb8] sm:$0xff]  ;;  %v238_v24 = vld [vmem:[%s1160_s27 + $0xb0] sm:$0xff]  ;;  %p1008_p5 = pnand %p1007_p3, %p1001_p0 }
  0x22   : > { %v241_v25 = vld [vmem:[%s1160_s27 + $0xc8] sm:$0xff]  ;;  %v240_v26 = vld [vmem:[%s1160_s27 + $0xc0] sm:$0xff]  ;;  %v243_v27 = vld [vmem:[%s1160_s27 + $0xd8] sm:$0xff] }
  0x23   : > { %276 = vperm.xlu1 %997, %v221_v5   ;;  %271 = vperm.xlu0 %996, %v220_v6   ;;  %v242_v28 = vld [vmem:[%s1160_s27 + $0xd0] sm:$0xff]  ;;  %v245_v29 = vld [vmem:[%s1160_s27 + $0xe8] sm:$0xff]  ;;  %v244_v30 = vld [vmem:[%s1160_s27 + $0xe0] sm:$0xff] }
  0x24   : > { %v247_v31 = vld [vmem:[%s1160_s27 + $0xf8] sm:$0xff]  ;;  %v246_v32 = vld [vmem:[%s1160_s27 + $0xf0] sm:$0xff]  ;;  %v248_v37 = vld [vmem:[%s212_s3] sm:$0x3] }
  0x25   : > { %v1198_v38 = vrot.slane %v248_v37, %v412_v35  ;;  %v1200_v39 = vrot.slane %v248_v37, %v416_v36 }
  0x27   : > { %286 = vperm.xlu1 %997, %v223_v7   ;;  %281 = vperm.xlu0 %996, %v222_v8  }
  0x2b   : > { %296 = vperm.xlu1 %997, %v225_v9   ;;  %291 = vperm.xlu0 %996, %v224_v10  }
  0x2f   : > { %306 = vperm.xlu1 %997, %v227_v11   ;;  %301 = vperm.xlu0 %996, %v226_v12  }
  0x33   : > { %316 = vperm.xlu1 %997, %v229_v13   ;;  %311 = vperm.xlu0 %996, %v228_v14  }
  0x37   : > { %326 = vperm.xlu1 %997, %v231_v15   ;;  %321 = vperm.xlu0 %996, %v230_v16  }
  0x3b   : > { %336 = vperm.xlu1 %997, %v233_v17   ;;  %331 = vperm.xlu0 %996, %v232_v18  }
  0x3f   : > { %346 = vperm.xlu1 %997, %v235_v19   ;;  %341 = vperm.xlu0 %996, %v234_v20  }
  0x43   : > { %356 = vperm.xlu1 %997, %v237_v21   ;;  %351 = vperm.xlu0 %996, %v236_v22  }
  0x47   : > { %366 = vperm.xlu1 %997, %v239_v23   ;;  %361 = vperm.xlu0 %996, %v238_v24  }
  0x4b   : > { %376 = vperm.xlu1 %997, %v241_v25   ;;  %371 = vperm.xlu0 %996, %v240_v26  }
  0x4f   : > { %386 = vperm.xlu1 %997, %v243_v27   ;;  %381 = vperm.xlu0 %996, %v242_v28  }
  0x53   : > { %396 = vperm.xlu1 %997, %v245_v29   ;;  %391 = vperm.xlu0 %996, %v244_v30  }
  0x57   : > { %406 = vperm.xlu1 %997, %v247_v31   ;;  %401 = vperm.xlu0 %996, %v246_v32  }
  0x9a   : > { %v262_v40 = vpop.permute.xlu1 %261  ;;  %v252_v41 = vpop.permute.xlu0 %251 }
  0x9b   : > { %v424_v42 = vadd.f32 %v1198_v38, %v262_v40  ;;  %v425_v43 = vadd.f32 %v1200_v39, %v262_v40  ;;  %v420_v44 = vadd.f32 %v1198_v38, %v252_v41  ;;  %v421_v45 = vadd.f32 %v1200_v39, %v252_v41 }
  0x9d   : > { %v488_v46 = vmul.f32 0.1, %v424_v42  ;;  %v489_v47 = vmul.f32 0.1, %v425_v43  ;;  %vm616_vm0 = vcmp.eq.f32.partialorder %v424_v42, 0.0  ;;  %vm617_vm1 = vcmp.eq.f32.partialorder %v425_v43, 0.0 }
  0x9e   : > { %v484_v48 = vmul.f32 0.1, %v420_v44  ;;  %v485_v49 = vmul.f32 0.1, %v421_v45  ;;  %vm612_vm2 = vcmp.eq.f32.partialorder %v420_v44, 0.0  ;;  %vm613_vm3 = vcmp.eq.f32.partialorder %v421_v45, 0.0  ;;  %v267_v50 = vpop.permute.xlu1 %266  ;;  %v257_v51 = vpop.permute.xlu0 %256 }
  0x9f   : > { %v552_v52 = vmax.f32 %v424_v42, %v488_v46  ;;  %v553_v53 = vmax.f32 %v425_v43, %v489_v47  ;;  %v426_v54 = vadd.f32 %v1198_v38, %v267_v50  ;;  %v427_v55 = vadd.f32 %v1200_v39, %v267_v50 }
  0xa0   : > { %v548_v56 = vmax.f32 %v420_v44, %v484_v48  ;;  %v549_v57 = vmax.f32 %v421_v45, %v485_v49  ;;  %v422_v58 = vadd.f32 %v1198_v38, %v257_v51  ;;  %v423_v59 = vadd.f32 %v1200_v39, %v257_v51 }
  0xa1   : > { %v680_v60 = vsel %vm616_vm0, -1e+16, %v552_v52  ;;  %v681_v61 = vsel %vm617_vm1, -1e+16, %v553_v53  ;;  %v490_v62 = vmul.f32 0.1, %v426_v54 }
  0xa2   : > { %744 = vst [vmem:[%s1215_s6 + $0x20] sm:$0xff] %v680_v60  ;;  %745 = vst [vmem:[%s1215_s6 + $0x28] sm:$0xff] %v681_v61  ;;  %v676_v63 = vsel %vm612_vm2, -1e+16, %v548_v56  ;;  %v677_v0 = vsel %vm613_vm3, -1e+16, %v549_v57  ;;  %v277_v2 = vpop.permute.xlu1 %276  ;;  %v272_v3 = vpop.permute.xlu0 %271 }
  0xa3   : > { %v491_v1 = vmul.f32 0.1, %v427_v55  ;;  %740 = vst [vmem:[%s1215_s6] sm:$0xff] %v676_v63  ;;  %741 = vst [vmem:[%s1215_s6 + $0x8] sm:$0xff] %v677_v0  ;;  %v554_v4 = vmax.f32 %v426_v54, %v490_v62  ;;  %vm618_vm4 = vcmp.eq.f32.partialorder %v426_v54, 0.0  ;;  %vm619_vm5 = vcmp.eq.f32.partialorder %v427_v55, 0.0 }
  0xa4   : > { %v486_v5 = vmul.f32 0.1, %v422_v58  ;;  %v487_v7 = vmul.f32 0.1, %v423_v59  ;;  %vm614_vm6 = vcmp.eq.f32.partialorder %v422_v58, 0.0  ;;  %vm615_vm7 = vcmp.eq.f32.partialorder %v423_v59, 0.0 }
  0xa5   : > { %v555_v6 = vmax.f32 %v427_v55, %v491_v1  ;;  %v682_v8 = vsel %vm618_vm4, -1e+16, %v554_v4  ;;  %v430_v10 = vadd.f32 %v1198_v38, %v277_v2  ;;  %v431_v11 = vadd.f32 %v1200_v39, %v277_v2 }
  0xa6   : > { %v550_v9 = vmax.f32 %v422_v58, %v486_v5  ;;  %746 = vst [vmem:[%s1215_s6 + $0x30] sm:$0xff] %v682_v8  ;;  %v551_v13 = vmax.f32 %v423_v59, %v487_v7  ;;  %v428_v14 = vadd.f32 %v1198_v38, %v272_v3  ;;  %v429_v15 = vadd.f32 %v1200_v39, %v272_v3  ;;  %v287_v16 = vpop.permute.xlu1 %286  ;;  %v282_v17 = vpop.permute.xlu0 %281 }
  0xa7   : > { %v683_v12 = vsel %vm619_vm5, -1e+16, %v555_v6  ;;  %v494_v19 = vmul.f32 0.1, %v430_v10  ;;  %v495_v20 = vmul.f32 0.1, %v431_v11  ;;  %v434_v21 = vadd.f32 %v1198_v38, %v287_v16 }
  0xa8   : > { %747 = vst [vmem:[%s1215_s6 + $0x38] sm:$0xff] %v683_v12  ;;  %v678_v18 = vsel %vm614_vm6, -1e+16, %v550_v9  ;;  %v679_v22 = vsel %vm615_vm7, -1e+16, %v551_v13  ;;  %vm622_vm8 = vcmp.eq.f32.partialorder %v430_v10, 0.0  ;;  %v435_v28 = vadd.f32 %v1200_v39, %v287_v16 }
  0xa9   : > { %742 = vst [vmem:[%s1215_s6 + $0x10] sm:$0xff] %v678_v18  ;;  %vm623_vm9 = vcmp.eq.f32.partialorder %v431_v11, 0.0  ;;  %v492_v23 = vmul.f32 0.1, %v428_v14  ;;  %743 = vst [vmem:[%s1215_s6 + $0x18] sm:$0xff] %v679_v22  ;;  %v558_v24 = vmax.f32 %v430_v10, %v494_v19  ;;  %v559_v25 = vmax.f32 %v431_v11, %v495_v20 }
  0xaa   : > { %v493_v26 = vmul.f32 0.1, %v429_v15  ;;  %vm620_vm10 = vcmp.eq.f32.partialorder %v428_v14, 0.0  ;;  %vm621_vm11 = vcmp.eq.f32.partialorder %v429_v15, 0.0  ;;  %v498_v29 = vmul.f32 0.1, %v434_v21  ;;  %v297_v30 = vpop.permute.xlu1 %296  ;;  %v292_v31 = vpop.permute.xlu0 %291 }
  0xab   : > { %v556_v27 = vmax.f32 %v428_v14, %v492_v23  ;;  %v686_v32 = vsel %vm622_vm8, -1e+16, %v558_v24  ;;  %v687_v33 = vsel %vm623_vm9, -1e+16, %v559_v25  ;;  %vm626_vm12 = vcmp.eq.f32.partialorder %v434_v21, 0.0 }
  0xac   : > { %v557_v34 = vmax.f32 %v429_v15, %v493_v26  ;;  %750 = vst [vmem:[%s1215_s6 + $0x50] sm:$0xff] %v686_v32  ;;  %751 = vst [vmem:[%s1215_s6 + $0x58] sm:$0xff] %v687_v33  ;;  %v499_v36 = vmul.f32 0.1, %v435_v28  ;;  %v562_v37 = vmax.f32 %v434_v21, %v498_v29  ;;  %vm627_vm13 = vcmp.eq.f32.partialorder %v435_v28, 0.0 }
  0xad   : > { %v684_v35 = vsel %vm620_vm10, -1e+16, %v556_v27  ;;  %v432_v41 = vadd.f32 %v1198_v38, %v282_v17  ;;  %v433_v42 = vadd.f32 %v1200_v39, %v282_v17  ;;  %v438_v43 = vadd.f32 %v1198_v38, %v297_v30 }
  0xae   : > { %v685_v40 = vsel %vm621_vm11, -1e+16, %v557_v34  ;;  %748 = vst [vmem:[%s1215_s6 + $0x40] sm:$0xff] %v684_v35  ;;  %v563_v44 = vmax.f32 %v435_v28, %v499_v36  ;;  %v690_v45 = vsel %vm626_vm12, -1e+16, %v562_v37  ;;  %v439_v46 = vadd.f32 %v1200_v39, %v297_v30  ;;  %v307_v48 = vpop.permute.xlu1 %306  ;;  %v302_v49 = vpop.permute.xlu0 %301 }
  0xaf   : > { %749 = vst [vmem:[%s1215_s6 + $0x48] sm:$0xff] %v685_v40  ;;  %v436_v47 = vadd.f32 %v1198_v38, %v292_v31  ;;  %754 = vst [vmem:[%s1215_s6 + $0x70] sm:$0xff] %v690_v45  ;;  %v496_v50 = vmul.f32 0.1, %v432_v41  ;;  %v497_v51 = vmul.f32 0.1, %v433_v42  ;;  %v437_v55 = vadd.f32 %v1200_v39, %v292_v31 }
  0xb0   : > { %vm624_vm14 = vcmp.eq.f32.partialorder %v432_v41, 0.0  ;;  %vm625_vm15 = vcmp.eq.f32.partialorder %v433_v42, 0.0  ;;  %v691_v52 = vsel %vm627_vm13, -1e+16, %v563_v44  ;;  %v502_v53 = vmul.f32 0.1, %v438_v43 }
  0xb1   : > { %v503_v54 = vmul.f32 0.1, %v439_v46  ;;  %755 = vst [vmem:[%s1215_s6 + $0x78] sm:$0xff] %v691_v52  ;;  %v560_v56 = vmax.f32 %v432_v41, %v496_v50  ;;  %v561_v57 = vmax.f32 %v433_v42, %v497_v51  ;;  %vm630_vm0 = vcmp.eq.f32.partialorder %v438_v43, 0.0 }
  0xb2   : > { %vm631_vm1 = vcmp.eq.f32.partialorder %v439_v46, 0.0  ;;  %v566_v58 = vmax.f32 %v438_v43, %v502_v53  ;;  %v500_v60 = vmul.f32 0.1, %v436_v47  ;;  %v501_v61 = vmul.f32 0.1, %v437_v55  ;;  %v317_v62 = vpop.permute.xlu1 %316  ;;  %v312_v63 = vpop.permute.xlu0 %311 }
  0xb3   : > { %v567_v59 = vmax.f32 %v439_v46, %v503_v54  ;;  %v688_v0 = vsel %vm624_vm14, -1e+16, %v560_v56  ;;  %v689_v1 = vsel %vm625_vm15, -1e+16, %v561_v57  ;;  %vm628_vm2 = vcmp.eq.f32.partialorder %v436_v47, 0.0 }
  0xb4   : > { %vm629_vm3 = vcmp.eq.f32.partialorder %v437_v55, 0.0  ;;  %752 = vst [vmem:[%s1215_s6 + $0x60] sm:$0xff] %v688_v0  ;;  %753 = vst [vmem:[%s1215_s6 + $0x68] sm:$0xff] %v689_v1  ;;  %v694_v2 = vsel %vm630_vm0, -1e+16, %v566_v58  ;;  %v564_v4 = vmax.f32 %v436_v47, %v500_v60  ;;  %v565_v5 = vmax.f32 %v437_v55, %v501_v61 }
  0xb5   : > { %v695_v3 = vsel %vm631_vm1, -1e+16, %v567_v59  ;;  %758 = vst [vmem:[%s1215_s6 + $0x90] sm:$0xff] %v694_v2  ;;  %v442_v6 = vadd.f32 %v1198_v38, %v307_v48  ;;  %v443_v7 = vadd.f32 %v1200_v39, %v307_v48  ;;  %v440_v8 = vadd.f32 %v1198_v38, %v302_v49 }
  0xb6   : > { %759 = vst [vmem:[%s1215_s6 + $0x98] sm:$0xff] %v695_v3  ;;  %v441_v9 = vadd.f32 %v1200_v39, %v302_v49  ;;  %v692_v10 = vsel %vm628_vm2, -1e+16, %v564_v4  ;;  %v693_v11 = vsel %vm629_vm3, -1e+16, %v565_v5  ;;  %v446_v12 = vadd.f32 %v1198_v38, %v317_v62  ;;  %v327_v14 = vpop.permute.xlu1 %326  ;;  %v322_v15 = vpop.permute.xlu0 %321 }
  0xb7   : > { %v447_v13 = vadd.f32 %v1200_v39, %v317_v62  ;;  %756 = vst [vmem:[%s1215_s6 + $0x80] sm:$0xff] %v692_v10  ;;  %757 = vst [vmem:[%s1215_s6 + $0x88] sm:$0xff] %v693_v11  ;;  %v506_v16 = vmul.f32 0.1, %v442_v6  ;;  %v507_v17 = vmul.f32 0.1, %v443_v7  ;;  %v444_v34 = vadd.f32 %v1198_v38, %v312_v63 }
  0xb8   : > { %vm634_vm4 = vcmp.eq.f32.partialorder %v442_v6, 0.0  ;;  %vm635_vm5 = vcmp.eq.f32.partialorder %v443_v7, 0.0  ;;  %v504_v18 = vmul.f32 0.1, %v440_v8  ;;  %v505_v19 = vmul.f32 0.1, %v441_v9 }
  0xb9   : > { %vm632_vm6 = vcmp.eq.f32.partialorder %v440_v8, 0.0  ;;  %vm633_vm7 = vcmp.eq.f32.partialorder %v441_v9, 0.0  ;;  %v570_v20 = vmax.f32 %v442_v6, %v506_v16  ;;  %v571_v21 = vmax.f32 %v443_v7, %v507_v17 }
  0xba   : > { %v510_v22 = vmul.f32 0.1, %v446_v12  ;;  %v511_v23 = vmul.f32 0.1, %v447_v13  ;;  %v568_v24 = vmax.f32 %v440_v8, %v504_v18  ;;  %v569_v25 = vmax.f32 %v441_v9, %v505_v19  ;;  %v337_v26 = vpop.permute.xlu1 %336  ;;  %v332_v27 = vpop.permute.xlu0 %331 }
  0xbb   : > { %vm638_vm8 = vcmp.eq.f32.partialorder %v446_v12, 0.0  ;;  %vm639_vm9 = vcmp.eq.f32.partialorder %v447_v13, 0.0  ;;  %v698_v28 = vsel %vm634_vm4, -1e+16, %v570_v20  ;;  %v699_v29 = vsel %vm635_vm5, -1e+16, %v571_v21 }
  0xbc   : > { %v574_v30 = vmax.f32 %v446_v12, %v510_v22  ;;  %v575_v31 = vmax.f32 %v447_v13, %v511_v23  ;;  %762 = vst [vmem:[%s1215_s6 + $0xb0] sm:$0xff] %v698_v28  ;;  %763 = vst [vmem:[%s1215_s6 + $0xb8] sm:$0xff] %v699_v29  ;;  %v696_v32 = vsel %vm632_vm6, -1e+16, %v568_v24  ;;  %v697_v33 = vsel %vm633_vm7, -1e+16, %v569_v25 }
  0xbd   : > { %v445_v35 = vadd.f32 %v1200_v39, %v312_v63  ;;  %760 = vst [vmem:[%s1215_s6 + $0xa0] sm:$0xff] %v696_v32  ;;  %761 = vst [vmem:[%s1215_s6 + $0xa8] sm:$0xff] %v697_v33  ;;  %v450_v40 = vadd.f32 %v1198_v38, %v327_v14  ;;  %v451_v41 = vadd.f32 %v1200_v39, %v327_v14  ;;  %v508_v42 = vmul.f32 0.1, %v444_v34 }
  0xbe   : > { %v702_v36 = vsel %vm638_vm8, -1e+16, %v574_v30  ;;  %v703_v37 = vsel %vm639_vm9, -1e+16, %v575_v31  ;;  %vm636_vm10 = vcmp.eq.f32.partialorder %v444_v34, 0.0  ;;  %v347_v44 = vpop.permute.xlu1 %346  ;;  %v448_v49 = vadd.f32 %v1198_v38, %v322_v15  ;;  %v342_v51 = vpop.permute.xlu0 %341 }
  0xbf   : > { %766 = vst [vmem:[%s1215_s6 + $0xd0] sm:$0xff] %v702_v36  ;;  %767 = vst [vmem:[%s1215_s6 + $0xd8] sm:$0xff] %v703_v37  ;;  %v509_v43 = vmul.f32 0.1, %v445_v35  ;;  %vm637_vm11 = vcmp.eq.f32.partialorder %v445_v35, 0.0  ;;  %vm642_vm12 = vcmp.eq.f32.partialorder %v450_v40, 0.0  ;;  %v572_v47 = vmax.f32 %v444_v34, %v508_v42 }
  0xc0   : > { %v514_v45 = vmul.f32 0.1, %v450_v40  ;;  %v515_v46 = vmul.f32 0.1, %v451_v41  ;;  %vm643_vm13 = vcmp.eq.f32.partialorder %v451_v41, 0.0  ;;  %v449_v50 = vadd.f32 %v1200_v39, %v322_v15 }
  0xc1   : > { %v573_v48 = vmax.f32 %v445_v35, %v509_v43  ;;  %v454_v54 = vadd.f32 %v1198_v38, %v337_v26  ;;  %v455_v55 = vadd.f32 %v1200_v39, %v337_v26  ;;  %v700_v56 = vsel %vm636_vm10, -1e+16, %v572_v47 }
  0xc2   : > { %v578_v52 = vmax.f32 %v450_v40, %v514_v45  ;;  %v579_v53 = vmax.f32 %v451_v41, %v515_v46  ;;  %v512_v58 = vmul.f32 0.1, %v448_v49  ;;  %v452_v59 = vadd.f32 %v1198_v38, %v332_v27  ;;  %764 = vst [vmem:[%s1215_s6 + $0xc0] sm:$0xff] %v700_v56  ;;  %v357_v2 = vpop.permute.xlu1 %356  ;;  %v352_v9 = vpop.permute.xlu0 %351 }
  0xc3   : > { %v701_v57 = vsel %vm637_vm11, -1e+16, %v573_v48  ;;  %v513_v62 = vmul.f32 0.1, %v449_v50  ;;  %v453_v63 = vadd.f32 %v1200_v39, %v332_v27  ;;  %vm640_vm14 = vcmp.eq.f32.partialorder %v448_v49, 0.0 }
  0xc4   : > { %765 = vst [vmem:[%s1215_s6 + $0xc8] sm:$0xff] %v701_v57  ;;  %v706_v60 = vsel %vm642_vm12, -1e+16, %v578_v52  ;;  %v707_v61 = vsel %vm643_vm13, -1e+16, %v579_v53  ;;  %v576_v0 = vmax.f32 %v448_v49, %v512_v58  ;;  %vm641_vm15 = vcmp.eq.f32.partialorder %v449_v50, 0.0 }
  0xc5   : > { %770 = vst [vmem:[%s1215_s6 + $0xf0] sm:$0xff] %v706_v60  ;;  %771 = vst [vmem:[%s1215_s6 + $0xf8] sm:$0xff] %v707_v61  ;;  %v518_v1 = vmul.f32 0.1, %v454_v54  ;;  %v577_v3 = vmax.f32 %v449_v50, %v513_v62  ;;  %v519_v4 = vmul.f32 0.1, %v455_v55  ;;  %v458_v15 = vadd.f32 %v1198_v38, %v347_v44 }
  0xc6   : > { %vm646_vm0 = vcmp.eq.f32.partialorder %v454_v54, 0.0  ;;  %vm647_vm1 = vcmp.eq.f32.partialorder %v455_v55, 0.0  ;;  %v704_v5 = vsel %vm640_vm14, -1e+16, %v576_v0  ;;  %v516_v7 = vmul.f32 0.1, %v452_v59  ;;  %v367_v24 = vpop.permute.xlu1 %366  ;;  %v362_v29 = vpop.permute.xlu0 %361 }
  0xc7   : > { %v582_v6 = vmax.f32 %v454_v54, %v518_v1  ;;  %v517_v8 = vmul.f32 0.1, %v453_v63  ;;  %v705_v10 = vsel %vm641_vm15, -1e+16, %v577_v3  ;;  %768 = vst [vmem:[%s1215_s6 + $0xe0] sm:$0xff] %v704_v5  ;;  %v583_v11 = vmax.f32 %v455_v55, %v519_v4 }
  0xc8   : > { %vm644_vm2 = vcmp.eq.f32.partialorder %v452_v59, 0.0  ;;  %vm645_vm3 = vcmp.eq.f32.partialorder %v453_v63, 0.0  ;;  %769 = vst [vmem:[%s1215_s6 + $0xe8] sm:$0xff] %v705_v10  ;;  %v580_v13 = vmax.f32 %v452_v59, %v516_v7  ;;  %v459_v17 = vadd.f32 %v1200_v39, %v347_v44 }
  0xc9   : > { %v710_v12 = vsel %vm646_vm0, -1e+16, %v582_v6  ;;  %v581_v14 = vmax.f32 %v453_v63, %v517_v8  ;;  %v711_v16 = vsel %vm647_vm1, -1e+16, %v583_v11  ;;  %v456_v18 = vadd.f32 %v1198_v38, %v342_v51 }
  0xca   : > { %774 = vst [vmem:[%s1215_s6 + $0x110] sm:$0xff] %v710_v12  ;;  %v457_v19 = vadd.f32 %v1200_v39, %v342_v51  ;;  %775 = vst [vmem:[%s1215_s6 + $0x118] sm:$0xff] %v711_v16  ;;  %v708_v20 = vsel %vm644_vm2, -1e+16, %v580_v13  ;;  %v522_v22 = vmul.f32 0.1, %v458_v15  ;;  %v462_v23 = vadd.f32 %v1198_v38, %v357_v2  ;;  %v377_v46 = vpop.permute.xlu1 %376  ;;  %v372_v53 = vpop.permute.xlu0 %371 }
  0xcb   : > { %v709_v21 = vsel %vm645_vm3, -1e+16, %v581_v14  ;;  %772 = vst [vmem:[%s1215_s6 + $0x100] sm:$0xff] %v708_v20  ;;  %v523_v25 = vmul.f32 0.1, %v459_v17  ;;  %vm650_vm4 = vcmp.eq.f32.partialorder %v458_v15, 0.0  ;;  %v463_v32 = vadd.f32 %v1200_v39, %v357_v2 }
  0xcc   : > { %773 = vst [vmem:[%s1215_s6 + $0x108] sm:$0xff] %v709_v21  ;;  %v520_v26 = vmul.f32 0.1, %v456_v18  ;;  %v586_v27 = vmax.f32 %v458_v15, %v522_v22  ;;  %vm651_vm5 = vcmp.eq.f32.partialorder %v459_v17, 0.0  ;;  %v521_v28 = vmul.f32 0.1, %v457_v19 }
  0xcd   : > { %vm648_vm6 = vcmp.eq.f32.partialorder %v456_v18, 0.0  ;;  %v587_v30 = vmax.f32 %v459_v17, %v523_v25  ;;  %v526_v33 = vmul.f32 0.1, %v462_v23  ;;  %vm649_vm7 = vcmp.eq.f32.partialorder %v457_v19, 0.0 }
  0xce   : > { %v584_v31 = vmax.f32 %v456_v18, %v520_v26  ;;  %v714_v34 = vsel %vm650_vm4, -1e+16, %v586_v27  ;;  %v585_v35 = vmax.f32 %v457_v19, %v521_v28  ;;  %v460_v36 = vadd.f32 %v1198_v38, %v352_v9  ;;  %v387_v3 = vpop.permute.xlu1 %386  ;;  %v382_v11 = vpop.permute.xlu0 %381 }
  0xcf   : > { %v715_v37 = vsel %vm651_vm5, -1e+16, %v587_v30  ;;  %778 = vst [vmem:[%s1215_s6 + $0x130] sm:$0xff] %v714_v34  ;;  %v527_v41 = vmul.f32 0.1, %v463_v32  ;;  %v590_v42 = vmax.f32 %v462_v23, %v526_v33  ;;  %vm654_vm8 = vcmp.eq.f32.partialorder %v462_v23, 0.0 }
  0xd0   : > { %v712_v40 = vsel %vm648_vm6, -1e+16, %v584_v31  ;;  %779 = vst [vmem:[%s1215_s6 + $0x138] sm:$0xff] %v715_v37  ;;  %v713_v43 = vsel %vm649_vm7, -1e+16, %v585_v35  ;;  %v461_v44 = vadd.f32 %v1200_v39, %v352_v9  ;;  %vm655_vm9 = vcmp.eq.f32.partialorder %v463_v32, 0.0 }
  0xd1   : > { %776 = vst [vmem:[%s1215_s6 + $0x120] sm:$0xff] %v712_v40  ;;  %v524_v45 = vmul.f32 0.1, %v460_v36  ;;  %777 = vst [vmem:[%s1215_s6 + $0x128] sm:$0xff] %v713_v43  ;;  %v591_v47 = vmax.f32 %v463_v32, %v527_v41  ;;  %v718_v48 = vsel %vm654_vm8, -1e+16, %v590_v42  ;;  %v466_v49 = vadd.f32 %v1198_v38, %v367_v24 }
  0xd2   : > { %782 = vst [vmem:[%s1215_s6 + $0x150] sm:$0xff] %v718_v48  ;;  %v525_v50 = vmul.f32 0.1, %v461_v44  ;;  %vm652_vm10 = vcmp.eq.f32.partialorder %v460_v36, 0.0  ;;  %v467_v52 = vadd.f32 %v1200_v39, %v367_v24  ;;  %vm653_vm11 = vcmp.eq.f32.partialorder %v461_v44, 0.0  ;;  %v397_v25 = vpop.permute.xlu1 %396  ;;  %v392_v31 = vpop.permute.xlu0 %391 }
  0xd3   : > { %v588_v51 = vmax.f32 %v460_v36, %v524_v45  ;;  %v719_v54 = vsel %vm655_vm9, -1e+16, %v591_v47  ;;  %v530_v55 = vmul.f32 0.1, %v466_v49  ;;  %v464_v56 = vadd.f32 %v1198_v38, %v362_v29 }
  0xd4   : > { %783 = vst [vmem:[%s1215_s6 + $0x158] sm:$0xff] %v719_v54  ;;  %v589_v57 = vmax.f32 %v461_v44, %v525_v50  ;;  %v531_v59 = vmul.f32 0.1, %v467_v52  ;;  %vm658_vm12 = vcmp.eq.f32.partialorder %v466_v49, 0.0  ;;  %vm659_vm13 = vcmp.eq.f32.partialorder %v467_v52, 0.0 }
  0xd5   : > { %v716_v58 = vsel %vm652_vm10, -1e+16, %v588_v51  ;;  %v594_v60 = vmax.f32 %v466_v49, %v530_v55  ;;  %v465_v61 = vadd.f32 %v1200_v39, %v362_v29  ;;  %v528_v62 = vmul.f32 0.1, %v464_v56 }
  0xd6   : > { %780 = vst [vmem:[%s1215_s6 + $0x140] sm:$0xff] %v716_v58  ;;  %v717_v63 = vsel %vm653_vm11, -1e+16, %v589_v57  ;;  %v595_v0 = vmax.f32 %v467_v52, %v531_v59  ;;  %v470_v1 = vadd.f32 %v1198_v38, %v377_v46  ;;  %v471_v2 = vadd.f32 %v1200_v39, %v377_v46  ;;  %v407_v50 = vpop.permute.xlu1 %406  ;;  %v402_v55 = vpop.permute.xlu0 %401 }
  0xd7   : > { %781 = vst [vmem:[%s1215_s6 + $0x148] sm:$0xff] %v717_v63  ;;  %v722_v4 = vsel %vm658_vm12, -1e+16, %v594_v60  ;;  %v529_v5 = vmul.f32 0.1, %v465_v61  ;;  %v592_v6 = vmax.f32 %v464_v56, %v528_v62  ;;  %vm656_vm14 = vcmp.eq.f32.partialorder %v464_v56, 0.0 }
  0xd8   : > { %v723_v7 = vsel %vm659_vm13, -1e+16, %v595_v0  ;;  %786 = vst [vmem:[%s1215_s6 + $0x170] sm:$0xff] %v722_v4  ;;  %v534_v8 = vmul.f32 0.1, %v470_v1  ;;  %v468_v10 = vadd.f32 %v1198_v38, %v372_v53  ;;  %vm657_vm15 = vcmp.eq.f32.partialorder %v465_v61, 0.0 }
  0xd9   : > { %v535_v9 = vmul.f32 0.1, %v471_v2  ;;  %787 = vst [vmem:[%s1215_s6 + $0x178] sm:$0xff] %v723_v7  ;;  %v593_v12 = vmax.f32 %v465_v61, %v529_v5  ;;  %v720_v13 = vsel %vm656_vm14, -1e+16, %v592_v6  ;;  %vm662_vm0 = vcmp.eq.f32.partialorder %v470_v1, 0.0 }
  0xda   : > { %784 = vst [vmem:[%s1215_s6 + $0x160] sm:$0xff] %v720_v13  ;;  %v598_v14 = vmax.f32 %v470_v1, %v534_v8  ;;  %v469_v16 = vadd.f32 %v1200_v39, %v372_v53  ;;  %v532_v17 = vmul.f32 0.1, %v468_v10  ;;  %vm663_vm1 = vcmp.eq.f32.partialorder %v471_v2, 0.0 }
  0xdb   : > { %v599_v15 = vmax.f32 %v471_v2, %v535_v9  ;;  %v721_v18 = vsel %vm657_vm15, -1e+16, %v593_v12  ;;  %v474_v19 = vadd.f32 %v1198_v38, %v387_v3  ;;  %v475_v20 = vadd.f32 %v1200_v39, %v387_v3 }
  0xdc   : > { %785 = vst [vmem:[%s1215_s6 + $0x168] sm:$0xff] %v721_v18  ;;  %v726_v21 = vsel %vm662_vm0, -1e+16, %v598_v14  ;;  %v533_v23 = vmul.f32 0.1, %v469_v16  ;;  %v596_v24 = vmax.f32 %v468_v10, %v532_v17  ;;  %vm660_vm2 = vcmp.eq.f32.partialorder %v468_v10, 0.0 }
  0xdd   : > { %v727_v22 = vsel %vm663_vm1, -1e+16, %v599_v15  ;;  %790 = vst [vmem:[%s1215_s6 + $0x190] sm:$0xff] %v726_v21  ;;  %vm661_vm3 = vcmp.eq.f32.partialorder %v469_v16, 0.0  ;;  %v538_v26 = vmul.f32 0.1, %v474_v19  ;;  %v472_v30 = vadd.f32 %v1198_v38, %v382_v11 }
  0xde   : > { %791 = vst [vmem:[%s1215_s6 + $0x198] sm:$0xff] %v727_v22  ;;  %v539_v27 = vmul.f32 0.1, %v475_v20  ;;  %v597_v28 = vmax.f32 %v469_v16, %v533_v23  ;;  %v724_v29 = vsel %vm660_vm2, -1e+16, %v596_v24  ;;  %vm666_vm4 = vcmp.eq.f32.partialorder %v474_v19, 0.0 }
  0xdf   : > { %788 = vst [vmem:[%s1215_s6 + $0x180] sm:$0xff] %v724_v29  ;;  %v602_v32 = vmax.f32 %v474_v19, %v538_v26  ;;  %v473_v34 = vadd.f32 %v1200_v39, %v382_v11  ;;  %v478_v35 = vadd.f32 %v1198_v38, %v397_v25  ;;  %vm667_vm5 = vcmp.eq.f32.partialorder %v475_v20, 0.0 }
  0xe0   : > { %v603_v33 = vmax.f32 %v475_v20, %v539_v27  ;;  %v725_v36 = vsel %vm661_vm3, -1e+16, %v597_v28  ;;  %v536_v37 = vmul.f32 0.1, %v472_v30  ;;  %v479_v40 = vadd.f32 %v1200_v39, %v397_v25 }
  0xe1   : > { %789 = vst [vmem:[%s1215_s6 + $0x188] sm:$0xff] %v725_v36  ;;  %v730_v41 = vsel %vm666_vm4, -1e+16, %v602_v32  ;;  %v537_v43 = vmul.f32 0.1, %v473_v34  ;;  %v476_v44 = vadd.f32 %v1198_v38, %v392_v31  ;;  %vm664_vm6 = vcmp.eq.f32.partialorder %v472_v30, 0.0 }
  0xe2   : > { %v731_v42 = vsel %vm667_vm5, -1e+16, %v603_v33  ;;  %794 = vst [vmem:[%s1215_s6 + $0x1b0] sm:$0xff] %v730_v41  ;;  %v600_v45 = vmax.f32 %v472_v30, %v536_v37  ;;  %v542_v46 = vmul.f32 0.1, %v478_v35  ;;  %vm665_vm7 = vcmp.eq.f32.partialorder %v473_v34, 0.0 }
  0xe3   : > { %795 = vst [vmem:[%s1215_s6 + $0x1b8] sm:$0xff] %v731_v42  ;;  %v543_v47 = vmul.f32 0.1, %v479_v40  ;;  %v601_v48 = vmax.f32 %v473_v34, %v537_v43  ;;  %vm670_vm8 = vcmp.eq.f32.partialorder %v478_v35, 0.0  ;;  %v477_v49 = vadd.f32 %v1200_v39, %v392_v31 }
  0xe4   : > { %v728_v51 = vsel %vm664_vm6, -1e+16, %v600_v45  ;;  %v606_v52 = vmax.f32 %v478_v35, %v542_v46  ;;  %v540_v54 = vmul.f32 0.1, %v476_v44  ;;  %vm671_vm9 = vcmp.eq.f32.partialorder %v479_v40, 0.0 }
  0xe5   : > { %v607_v53 = vmax.f32 %v479_v40, %v543_v47  ;;  %v729_v56 = vsel %vm665_vm7, -1e+16, %v601_v48  ;;  %792 = vst [vmem:[%s1215_s6 + $0x1a0] sm:$0xff] %v728_v51  ;;  %v541_v57 = vmul.f32 0.1, %v477_v49  ;;  %vm668_vm10 = vcmp.eq.f32.partialorder %v476_v44, 0.0 }
  0xe6   : > { %793 = vst [vmem:[%s1215_s6 + $0x1a8] sm:$0xff] %v729_v56  ;;  %v734_v58 = vsel %vm670_vm8, -1e+16, %v606_v52  ;;  %v604_v60 = vmax.f32 %v476_v44, %v540_v54  ;;  %v482_v61 = vadd.f32 %v1198_v38, %v407_v50  ;;  %v483_v63 = vadd.f32 %v1200_v39, %v407_v50 }
  0xe7   : > { %v735_v59 = vsel %vm671_vm9, -1e+16, %v607_v53  ;;  %798 = vst [vmem:[%s1215_s6 + $0x1d0] sm:$0xff] %v734_v58  ;;  %v605_v62 = vmax.f32 %v477_v49, %v541_v57  ;;  %v480_v0 = vadd.f32 %v1198_v38, %v402_v55  ;;  %v481_v1 = vadd.f32 %v1200_v39, %v402_v55 }
  0xe8   : > { %799 = vst [vmem:[%s1215_s6 + $0x1d8] sm:$0xff] %v735_v59  ;;  %vm669_vm11 = vcmp.eq.f32.partialorder %v477_v49, 0.0  ;;  %v732_v2 = vsel %vm668_vm10, -1e+16, %v604_v60  ;;  %v546_v3 = vmul.f32 0.1, %v482_v61 }
  0xe9   : > { %v733_v4 = vsel %vm669_vm11, -1e+16, %v605_v62  ;;  %796 = vst [vmem:[%s1215_s6 + $0x1c0] sm:$0xff] %v732_v2  ;;  %v547_v5 = vmul.f32 0.1, %v483_v63  ;;  %vm674_vm12 = vcmp.eq.f32.partialorder %v482_v61, 0.0 }
  0xea   : > { %797 = vst [vmem:[%s1215_s6 + $0x1c8] sm:$0xff] %v733_v4  ;;  %v610_v6 = vmax.f32 %v482_v61, %v546_v3  ;;  %v544_v7 = vmul.f32 0.1, %v480_v0  ;;  %v545_v8 = vmul.f32 0.1, %v481_v1  ;;  %vm675_vm13 = vcmp.eq.f32.partialorder %v483_v63, 0.0 }
  0xeb   : > { %v611_v9 = vmax.f32 %v483_v63, %v547_v5  ;;  %vm672_vm14 = vcmp.eq.f32.partialorder %v480_v0, 0.0  ;;  %vm673_vm15 = vcmp.eq.f32.partialorder %v481_v1, 0.0 }
  0xec   : > { %v738_v38 = vsel %vm674_vm12, -1e+16, %v610_v6  ;;  %v608_v39 = vmax.f32 %v480_v0, %v544_v7  ;;  %v609_v10 = vmax.f32 %v481_v1, %v545_v8 }
  0xed   : > { %v739_v11 = vsel %vm675_vm13, -1e+16, %v611_v9  ;;  %802 = vst [vmem:[%s1215_s6 + $0x1f0] sm:$0xff] %v738_v38 }
  0xee   : > { %803 = vst [vmem:[%s1215_s6 + $0x1f8] sm:$0xff] %v739_v11  ;;  %v736_v12 = vsel %vm672_vm14, -1e+16, %v608_v39  ;;  %v737_v13 = vsel %vm673_vm15, -1e+16, %v609_v10 }
  0xef   : > { %800 = vst [vmem:[%s1215_s6 + $0x1e0] sm:$0xff] %v736_v12  ;;  %801 = vst [vmem:[%s1215_s6 + $0x1e8] sm:$0xff] %v737_v13 }
  0xf0   : > { %1011 = shalt.err (!%p1008_p5)
}
  0xf1   : > { %s1012_s26 = scalar_lea.hbm %s1355_s12, 8192  ;;  %s1016_s29 = scalar_lea.hbm %s1413_s2, 16384 }
  0xf2   : > { %p1013_p6 = scmp.ne.s32.totalorder %s1355_s12, %s1012_s26  ;;  %p1017_p10 = scmp.lt.u32.totalorder %s1355_s12, %s1413_s2 }
  0xf3   : > { %p1018_p11 = scmp.lt.u32.totalorder %s1016_s29, %s1012_s26  ;;  %p1020_p13 = scmp.lt.u32.totalorder %s1012_s26, %s1355_s12 }
  0xf4   : > { %p1014_p7 = pnand %p1013_p6, %p1137_p4 }
  0xf5   : > { %p1019_p12 = por %p1018_p11, %p1017_p10 }
  0xf6   : > { %p1015_p9 = pneg %p1014_p7 }
  0xf7   : > { %p1021_p0 = por %p1020_p13, %p1019_p12 }
  0xf9   : > { %p1022_p1 = pnand %p1021_p0, %p1015_p9 }
  0xfb   : > { %1025 = shalt.err (!%p1022_p1)
}
  0xfc   : > { %s1080_s4 = smov 256   ;;  %s1081_s5 = smov 16  }
  0xfd   : > { %938 = dma.vmem_to_hbm [thread:$0]  (%p1137_p4), %s1357_s8, 8192, %s1355_s12, %s1365_s18, %s1080_s4, %s1080_s4, %s1081_s5  }
  0xfe PF: > { %p944_p2 = scmp.ge.s32.totalorder %s1076_s14, 2  ;;  %s838_s6 = sand.u32 1, %s1056_s9  }
  0xff   : > { %s839_s7 = scalar_lea.sflag [#allocation3], %s838_s6 }
 0x100   : > { %p941_p3 = pnand %p944_p2, %p1144_p8 }
 0x102   : > { %1051 = dma.done.wait (!%p941_p3), %s839_s7, 8192  }
 0x103   : > { %1053 = vsyncadd (!%p941_p3), %s839_s7, 4294959104  ;;  %s15_s14 = sadd.s32 1, %s1076_s14   ;;  %s1416_s9 = smov %s1060_s10 }
 0x104   : > { %p12_p5 = scmp.ge.s32.totalorder %s15_s14, 4   ;;  %s1417_s10 = smov %s1064_s11 }
 0x105   : > { %s1418_s11 = smov %s1150_s22  ;;  %s1419_s12 = smov %s1072_s13 }
 0x106   : > { %s1420_s13 = smov %s1422_s17  ;;  %14 = sbr.rel (!%p12_p5) target bundleno = 4 (0x4), region = 66 }
 0x10d   :  { %844 = vsyncpa [#allocation3], 1 }
 0x10e   :  { %846 = vsyncpa [#allocation3 + $0x1], 1 }

</bundles_post_ra>
